<compile_context>
chip_gen: v5e
topology: v5e:2x2
jax: 0.10.0
libtpu: 0.0.40
codegen_flags: <defaults>
</compile_context>

<pallas_src>
import functools

import jax
import jax.numpy as jnp
from jax.experimental import pallas as pl
from jax.experimental.pallas import tpu as pltpu


def _skip_block_kernel(p_ref, s_ref, w_ref, b_ref, o_ref, *, c_main):
    # p_ref : (1, 9*C_in, HW)   im2col'd 3x3 taps for this batch element
    # s_ref : (1, C_in,  HW)    skip branch = identity(input), channel-major
    # w_ref : (C_main, 9*C_in)  conv weight, tap-major / ci-minor
    # b_ref : (C_main, 1)       conv bias (broadcast over lanes)
    # o_ref : (1, C_main + C_in, HW)  lane-dense output slab
    main = jnp.dot(w_ref[...], p_ref[0], preferred_element_type=jnp.float32)
    main = jnp.maximum(main + b_ref[...], 0.0)            # conv bias + ReLU
    o_ref[0, :c_main, :] = main.astype(o_ref.dtype)       # main(input)
    o_ref[0, c_main:, :] = s_ref[0].astype(o_ref.dtype)   # skip(input) = input


def skip_block_forward(x, params):
    """SkipBlock.forward: cat([main(x), skip(x)], dim=1), NCHW in/out."""
    B, c_in, H, W = x.shape
    w = params["conv_w"]                      # (C_main, C_in, 3, 3)  (PyTorch OIHW)
    b = params["conv_b"]                      # (C_main,)
    c_main = w.shape[0]
    hw = H * W
    c_total = c_main + c_in

    # ---- layout plumbing only (no arithmetic) -------------------------------
    # im2col the 3x3/pad=1 taps so the conv becomes one GEMM inside the kernel,
    # kept channel-major so the concatenated output is a lane-dense (C, H*W) slab.
    x_pad = jnp.pad(x, ((0, 0), (0, 0), (1, 1), (1, 1)))
    taps = [x_pad[:, :, dy:dy + H, dx:dx + W] for dy in range(3) for dx in range(3)]
    patches = jnp.stack(taps, axis=1).reshape(B, 9 * c_in, hw)     # (B, 9*C_in, HW)
    x_skip = x.reshape(B, c_in, hw)                                # (B, C_in, HW)
    w2d = jnp.transpose(w, (0, 2, 3, 1)).reshape(c_main, 9 * c_in)  # tap-major, ci-minor
    b2d = b.reshape(c_main, 1)

    cost = pl.CostEstimate(
        flops=2 * B * c_main * 9 * c_in * hw,
        transcendentals=0,
        bytes_accessed=4 * (patches.size + x_skip.size + w2d.size + b2d.size
                            + B * c_total * hw),
    )

    out = pl.pallas_call(
        functools.partial(_skip_block_kernel, c_main=c_main),
        out_shape=jax.ShapeDtypeStruct((B, c_total, hw), x.dtype),
        grid_spec=pltpu.PrefetchScalarGridSpec(
            num_scalar_prefetch=0,
            grid=(B,),
            in_specs=[
                pl.BlockSpec((1, 9 * c_in, hw), lambda i: (i, 0, 0)),
                pl.BlockSpec((1, c_in, hw), lambda i: (i, 0, 0)),
                pl.BlockSpec((c_main, 9 * c_in), lambda i: (0, 0)),
                pl.BlockSpec((c_main, 1), lambda i: (0, 0)),
            ],
            out_specs=pl.BlockSpec((1, c_total, hw), lambda i: (i, 0, 0)),
        ),
        compiler_params=pltpu.CompilerParams(
            dimension_semantics=("parallel",),   # B=2 -> even split across v7x TCs
        ),
        cost_estimate=cost,
    )(patches, x_skip, w2d, b2d)

    # Free reshape of the minor dim back to NCHW: (B, C_total, H*W) -> (B, C_total, H, W)
    return out.reshape(B, c_total, H, W)


def init_params(key, c_in, c_main):
    kw, kb = jax.random.split(key)
    conv_w = jax.random.normal(kw, (c_main, c_in, 3, 3), jnp.float32) * 0.1
    conv_b = jax.random.normal(kb, (c_main,), jnp.float32) * 0.1
    return {"conv_w": conv_w, "conv_b": conv_b}


if __name__ == "__main__":
    key = jax.random.PRNGKey(0)
    kx, kp = jax.random.split(key)

    B, C_IN, H, W = 2, 4, 16, 16
    C_MAIN = 4

    x = jax.random.normal(kx, (B, C_IN, H, W), jnp.float32)
    params = init_params(kp, C_IN, C_MAIN)

    out = jax.block_until_ready(skip_block_forward(x, params))
    assert out.shape == (B, C_MAIN + C_IN, H, W), out.shape

    # Pure-JAX reference: Conv2d(3x3, pad=1) + bias + ReLU, concat with identity skip.
    main_ref = jax.lax.conv_general_dilated(
        x, params["conv_w"], window_strides=(1, 1), padding="SAME",
        dimension_numbers=("NCHW", "OIHW", "NCHW"))
    main_ref = jnp.maximum(main_ref + params["conv_b"][None, :, None, None], 0.0)
    ref = jnp.concatenate([main_ref, x], axis=1)

    err = float(jnp.max(jnp.abs(out - ref)))
    assert jnp.allclose(out, ref, atol=1e-4, rtol=1e-4), err

    print("KERNEL_OK")
</pallas_src>

<mosaic_0001>
module attributes {stable_mosaic.version = 11 : i64} {
  func.func @_skip_block_kernel(%arg0: i32, %arg1: memref<1x36x256xf32, #tpu.memory_space<vmem>>, %arg2: memref<1x4x256xf32, #tpu.memory_space<vmem>>, %arg3: memref<4x36xf32, #tpu.memory_space<vmem>>, %arg4: memref<4x1xf32, #tpu.memory_space<vmem>>, %arg5: memref<1x8x256xf32, #tpu.memory_space<vmem>>) attributes {dimension_semantics = [#tpu.dimension_semantics<parallel>], iteration_bounds = array<i64: 2>, scalar_prefetch = 0 : i64, scratch_operands = 0 : i64, tpu.core_type = #tpu.core_type<tc>, window_params = [{transform_indices = @transform_0, window_bounds = array<i64: 1, 36, 256>}, {transform_indices = @transform_1, window_bounds = array<i64: 1, 4, 256>}, {pipeline_mode = #tpu.pipeline_mode<synchronous>, transform_indices = @transform_2, window_bounds = array<i64: 4, 36>}, {pipeline_mode = #tpu.pipeline_mode<synchronous>, transform_indices = @transform_3, window_bounds = array<i64: 4, 1>}, {transform_indices = @transform_4, window_bounds = array<i64: 1, 8, 256>}]} {
    %c0 = arith.constant 0 : index
    %c0_0 = arith.constant 0 : index
    %0 = vector.load %arg3[%c0, %c0_0] : memref<4x36xf32, #tpu.memory_space<vmem>>, vector<4x36xf32>
    %c0_1 = arith.constant 0 : index
    %c0_2 = arith.constant 0 : index
    %c0_3 = arith.constant 0 : index
    %1 = vector.load %arg1[%c0_1, %c0_2, %c0_3] : memref<1x36x256xf32, #tpu.memory_space<vmem>>, vector<1x36x256xf32>
    %2 = vector.shape_cast %1 : vector<1x36x256xf32> to vector<36x256xf32>
    %cst = arith.constant dense<0.000000e+00> : vector<4x256xf32>
    %3 = tpu.matmul %0, %2, %cst {dimension_numbers = #tpu.dot_dimension_numbers<[1], [0], [0], [1], [0, 0, 1, 1], [], []>} : vector<4x36xf32>, vector<36x256xf32>, vector<4x256xf32> -> vector<4x256xf32>
    %c0_4 = arith.constant 0 : index
    %c0_5 = arith.constant 0 : index
    %4 = vector.load %arg4[%c0_4, %c0_5] : memref<4x1xf32, #tpu.memory_space<vmem>>, vector<4x1xf32>
    %5 = vector.broadcast %4 : vector<4x1xf32> to vector<4x256xf32>
    %6 = arith.addf %3, %5 : vector<4x256xf32>
    %cst_6 = arith.constant 0.000000e+00 : f32
    %7 = vector.broadcast %cst_6 : f32 to vector<4x256xf32>
    %8 = arith.maximumf %6, %7 : vector<4x256xf32>
    %c0_7 = arith.constant 0 : index
    %c0_8 = arith.constant 0 : index
    %c0_9 = arith.constant 0 : index
    %9 = vector.load %arg5[%c0_7, %c0_8, %c0_9] : memref<1x8x256xf32, #tpu.memory_space<vmem>>, vector<1x4x256xf32>
    %10 = vector.shape_cast %9 : vector<1x4x256xf32> to vector<4x256xf32>
    %11 = vector.shape_cast %8 : vector<4x256xf32> to vector<1x4x256xf32>
    tpu.vector_store %arg5[%c0_7, %c0_8, %c0_9], %11 {strides = array<i32>} : memref<1x8x256xf32, #tpu.memory_space<vmem>>, vector<1x4x256xf32>,
    %c0_10 = arith.constant 0 : index
    %c0_11 = arith.constant 0 : index
    %c0_12 = arith.constant 0 : index
    %12 = vector.load %arg2[%c0_10, %c0_11, %c0_12] : memref<1x4x256xf32, #tpu.memory_space<vmem>>, vector<1x4x256xf32>
    %13 = vector.shape_cast %12 : vector<1x4x256xf32> to vector<4x256xf32>
    %c0_13 = arith.constant 0 : index
    %c4 = arith.constant 4 : index
    %c0_14 = arith.constant 0 : index
    %14 = vector.load %arg5[%c0_13, %c4, %c0_14] : memref<1x8x256xf32, #tpu.memory_space<vmem>>, vector<1x4x256xf32>
    %15 = vector.shape_cast %14 : vector<1x4x256xf32> to vector<4x256xf32>
    %16 = vector.shape_cast %13 : vector<4x256xf32> to vector<1x4x256xf32>
    tpu.vector_store %arg5[%c0_13, %c4, %c0_14], %16 {strides = array<i32>} : memref<1x8x256xf32, #tpu.memory_space<vmem>>, vector<1x4x256xf32>,
    return
  }
  func.func @transform_0(%arg0: i32) -> (i32, i32, i32) {
    %c0_i32 = arith.constant 0 : i32
    %c0_i32_0 = arith.constant 0 : i32
    %c0_i32_1 = arith.constant 0 : i32
    return %arg0, %c0_i32, %c0_i32_0 : i32, i32, i32
  }
  func.func @transform_1(%arg0: i32) -> (i32, i32, i32) {
    %c0_i32 = arith.constant 0 : i32
    %c0_i32_0 = arith.constant 0 : i32
    %c0_i32_1 = arith.constant 0 : i32
    return %arg0, %c0_i32, %c0_i32_0 : i32, i32, i32
  }
  func.func @transform_2(%arg0: i32) -> (i32, i32) {
    %c0_i32 = arith.constant 0 : i32
    %c0_i32_0 = arith.constant 0 : i32
    %c0_i32_1 = arith.constant 0 : i32
    return %c0_i32, %c0_i32_0 : i32, i32
  }
  func.func @transform_3(%arg0: i32) -> (i32, i32) {
    %c0_i32 = arith.constant 0 : i32
    %c0_i32_0 = arith.constant 0 : i32
    %c0_i32_1 = arith.constant 0 : i32
    return %c0_i32, %c0_i32_0 : i32, i32
  }
  func.func @transform_4(%arg0: i32) -> (i32, i32, i32) {
    %c0_i32 = arith.constant 0 : i32
    %c0_i32_0 = arith.constant 0 : i32
    %c0_i32_1 = arith.constant 0 : i32
    return %arg0, %c0_i32, %c0_i32_0 : i32, i32, i32
  }
}

</mosaic_0001>

<bundles_post_ra>
// kernel: tpu_custom_call.1
= control target key start
LH: loop header
LB: loop body
LE: loop exit
PB: predicated region body
PF: predicated region fallthrough
CT: control target
= control target key end

     0   :  { %9 = vsyncpa [#allocation3], 0  ;;  %s631_s0 = inlined_call_operand.vmem [shape: f32[2,36,256], index: 0, kind: input, shape index: {}]   ;;  %s632_s1 = inlined_call_operand.vmem [shape: f32[2,4,256], index: 1, kind: input, shape index: {}]   ;;  %s633_s2 = inlined_call_operand.vmem [shape: f32[4,36], index: 2, kind: input, shape index: {}]   ;;  %s634_s3 = inlined_call_operand.vmem [shape: f32[4,1], index: 3, kind: input, shape index: {}]   ;;  %s635_s4 = inlined_call_operand.hbm [shape: f32[2,8,256], index: 4, kind: output, shape index: {}]  }
   0x1   :  { %11 = vsyncpa [#allocation3 + $0x1], 0  ;;  %s537_s15 = smov 0   ;;  %s539_s16 = smov 0  }
   0x2   :  { %s541_s17 = smov 0   ;;  %s543_s18 = smov 0  }
   0x3 LB: > { %s558_s19 = sadd.s32 4294967295, %s509_s18   ;;  %s386_s20 = sadd.s32 4294967294, %s509_s18   ;;  %s509_s18 = sphi %s543_s18, %s641_s18   ;;  %s505_s17 = sphi %s541_s17, %s640_s17   ;;  %s501_s16 = sphi %s539_s16, %s639_s16   ;;  %s497_s15 = sphi %s537_s15, %s638_s15  }
   0x4   : > { %s562_s21 = sadd.s32 1, %s509_s18   ;;  %s118_s22 = sadd.s32 1, %s505_s17 }
   0x5   : > { %s115_s23 = ssub.s32 %s509_s18, %s562_s21  ;;  %p128_p0 = scmp.ne.s32.totalorder %s505_s17, %s501_s16 }
   0x6   : > { %p116_p1 = scmp.eq.s32.totalorder %s115_s23, 0  ;;  %p129_p2 = scmp.eq.s32.totalorder %s558_s19, 1 }
   0x7   : > { %p134_p3 = scmp.ne.s32.totalorder %s501_s16, %s497_s15  ;;  %p135_p4 = scmp.eq.s32.totalorder %s386_s20, 1 }
   0x8   : > { %s573_s24 = scalar_select %p116_p1, %s505_s17, %s118_s22  }
   0x9   : > { %p575_p5 = por %p129_p2, %p128_p0  ;;  %p579_p6 = por %p135_p4, %p134_p3 }
   0xa   : > { %p389_p7 = scmp.ge.s32.totalorder %s509_s18, 1  ;;  %p175_p8 = scmp.lt.s32.totalorder %s509_s18, 3 }
   0xc   : > { %p176_p9 = pnand %p389_p7, %p175_p8 }
   0xd   : > { %p206_p10 = scmp.lt.s32.totalorder (!%p176_p9), %s558_s19, 1  ;;  %s203_s14 = sand.u32 (!%p176_p9), 1, %s501_s16  }
   0xe   : > { %179 = sbr.rel (%p176_p9) target bundleno = 168 (0xa8), region = 36  ;;  %s390_s20 = sshll.u32 (!%p176_p9), %s203_s14, 4 }
   0xf   : > { %s205_s22 = scalar_lea.vmem (!%p176_p9), [#allocation2], %s390_s20  ;;  %s404_s23 = sshll.u32 (!%p176_p9), %s558_s19, 4 }
  0x10   : > { %s299_s6 = scalar_lea.sflag (!%p176_p9), [#allocation3], %s203_s14  ;;  %s467_s10 = scalar_lea.hbm (!%p176_p9), %s635_s4, 32 }
  0x13   : > { %v511_v0 = vmov 0   ;;  %v227_v1 = vld [vmem:[%s634_s3] sm:$0xf]  ;;  %s207_s29 = scalar_select %p206_p10, %s558_s19, 1  ;;  %vm237_vm0 = vcmask 1043456   ;;  %vm233_vm1 = vcmask 293888  }
  0x14   : > { %446 = vset.pattern.permute.xlu0 %v511_v0  ;;  %v216_v13 = vld [vmem:[%s633_s2] sm:$0xf] }
  0x15   : > { %230 = vperm.xlu0 %446, %v227_v1   ;;  %s405_s30 = smul.u32 80, %s207_s29  ;;  %s403_s5 = sshll.u32 %s207_s29, 3 }
  0x16   : > { %s215_s8 = scalar_lea.vmem %s632_s1, %s403_s5  ;;  %s310_s29 = scalar_lea.hbm %s635_s4, %s404_s23 }
  0x17   : > { %s210_s11 = scalar_lea.vmem %s631_s0, %s405_s30  ;;  %v288_v2 = vld [vmem:[%s215_s8] sm:$0xff]  ;;  %s312_s30 = sshll.u32 %s205_s22, 4  ;;  %s313_s30 = int_to_ptr.vmem [resolvable:$true] %s312_s30 }
  0x18   : > { %v225_v3 = vld [vmem:[%s210_s11 + $0x40] sm:$0xf]  ;;  %291 = vst [vmem:[#allocation1 + $0x1] ss:$2 sm:$0xff] %v288_v2  ;;  %v226_v4 = vld [vmem:[%s210_s11 + $0x48] sm:$0xf] }
  0x19   : > { %394 = vmatpush.msk.msra.mxu0 %vm237_vm0, %v225_v3  ;;  %396 = vmatpush.msk.msra.mxu1 %vm237_vm0, %v226_v4  ;;  %v223_v5 = vld [vmem:[%s210_s11 + $0x30] sm:$0xff]  ;;  %v224_v6 = vld [vmem:[%s210_s11 + $0x38] sm:$0xff]  ;;  %v221_v7 = vld [vmem:[%s210_s11 + $0x20] sm:$0xff]  ;;  %s314_s5 = sshll.u32 %s310_s29, 4  ;;  %s315_s5 = int_to_ptr.hbm [resolvable:$true] %s314_s5 }
  0x1a   : > { %v222_v8 = vld [vmem:[%s210_s11 + $0x28] sm:$0xff]  ;;  %v219_v9 = vld [vmem:[%s210_s11 + $0x10] sm:$0xff]  ;;  %v220_v10 = vld [vmem:[%s210_s11 + $0x18] sm:$0xff]  ;;  %s461_s19 = sshra.s32 %s315_s5, 4  ;;  %s462_s19 = int_to_ptr.hbm [resolvable:$true] %s461_s19 }
  0x1b   : > { %256 = vmatpush.msra.mxu0 %v223_v5  ;;  %276 = vmatpush.msra.mxu1 %v224_v6  ;;  %v217_v11 = vld [vmem:[%s210_s11] sm:$0xff]  ;;  %v218_v12 = vld [vmem:[%s210_s11 + $0x8] sm:$0xff]  ;;  %s463_s7 = scalar_lea.hbm %s462_s19, 16  ;;  %p468_p0 = scmp.lt.s32.totalorder %s462_s19, %s635_s4 }
  0x1c   : > { %p464_p11 = scmp.ne.s32.totalorder %s462_s19, %s463_s7  ;;  %p469_p1 = scmp.lt.s32.totalorder %s467_s10, %s463_s7 }
  0x1d   : > { %257 = vmatpush.msra.mxu0 %v221_v7  ;;  %277 = vmatpush.msra.mxu1 %v222_v8 }
  0x1e   : > { %p465_p12 = pnand %p464_p11, %p575_p5  ;;  %p470_p2 = por %p469_p1, %p468_p0 }
  0x1f   : > { %258 = vmatpush.msra.mxu0 %v219_v9  ;;  %278 = vmatpush.msra.mxu1 %v220_v10  ;;  %v292_v14 = vld.sshfl [vmem:[#allocation1] sm:$0xff pattern:$0x75316420]  ;;  %v293_v15 = vld.sshfl [vmem:[#allocation1 + $0x8] sm:$0xff pattern:$0x75316420] }
  0x20   : > { %296 = vst [vmem:[%s205_s22] sm:$0xf0] %v292_v14  ;;  %p466_p13 = pneg %p465_p12 }
  0x21   : > { %259 = vmatpush.msra.mxu0 %v217_v11  ;;  %279 = vmatpush.msra.mxu1 %v218_v12  ;;  %297 = vst [vmem:[%s205_s22 + $0x8] sm:$0xf0] %v293_v15 }
  0x22   : > { %395 = vmatmul.msk.f32.vlgmr.msra.gmra.mxu0 %vm233_vm1, %v216_v13  ;;  %397 = vmatmul.msk.f32.vlgmr.msra.gmra.mxu1 %vm233_vm1, %v216_v13  ;;  %p471_p3 = pnand %p470_p2, %p466_p13 }
  0x87   : > { %v231_v16 = vpop.permute.xlu0 %230 }
  0x9f   : > { %v261_v17 = vpop.f32.mrf.mxu0  ;;  %v281_v18 = vpop.f32.mrf.mxu1 }
  0xa0   : > { %v262_v19 = vadd.f32 %v261_v17, %v231_v16  ;;  %v282_v20 = vadd.f32 %v281_v18, %v231_v16 }
  0xa2   : > { %v284_v21 = vmax.f32 %v262_v19, 0.0  ;;  %v285_v22 = vmax.f32 %v282_v20, 0.0 }
  0xa4   : > { %286 = vst [vmem:[%s205_s22] sm:$0xf] %v284_v21 }
  0xa5   : > { %287 = vst [vmem:[%s205_s22 + $0x8] sm:$0xf] %v285_v22 }
  0xa6   : > { %474 = shalt.err (!%p471_p3)
}
  0xa7   : > { %406 = dma.vmem_to_hbm [thread:$0]  (%p575_p5), %s313_s30, 256, %s315_s5, %s299_s6  }
  0xa8 PF: > { %p412_p4 = scmp.ge.s32.totalorder %s509_s18, 2  ;;  %s326_s13 = sand.u32 1, %s497_s15  }
  0xa9   : > { %s327_s14 = scalar_lea.sflag [#allocation3], %s326_s13 }
  0xaa   : > { %p409_p7 = pnand %p412_p4, %p579_p6 }
  0xac   : > { %p410_p8 = pneg %p409_p7 }
  0xae   : > { %492 = dma.done.wait (%p410_p8), %s327_s14, 256  }
  0xaf   : > { %494 = vsyncadd (%p410_p8), %s327_s14, 4294967040  ;;  %p14_p9 = scmp.ge.s32.totalorder %s562_s21, 4   ;;  %s638_s15 = smov %s501_s16 }
  0xb0   : > { %s639_s16 = smov %s505_s17  ;;  %s640_s17 = smov %s573_s24 }
  0xb1   : > { %s641_s18 = smov %s562_s21  ;;  %16 = sbr.rel (!%p14_p9) target bundleno = 3 (0x3), region = 75 }
  0xb6   :  { %333 = vsyncpa [#allocation3], 1 }
  0xb7   :  { %335 = vsyncpa [#allocation3 + $0x1], 1 }

</bundles_post_ra>
